<compile_context>
chip_gen: v7x
topology: tpu7x:2x2x1
jax: 0.10.0
libtpu: 0.0.40
codegen_flags: <defaults>
</compile_context>

<pallas_src>
import functools

import jax
import jax.numpy as jnp
import numpy as np
from jax.experimental import pallas as pl
from jax.experimental.pallas import tpu as pltpu


def _round_up(x, m):
    return (x + m - 1) // m * m


def _hat_mask_kernel(s_ref, t_ref, emb_ref, out_ref, tbl_ref, *,
                     binarize, skip_scale, table_first, tb, b, b_padded):
    # s_ref:   (1,)               float32, SMEM (scalar prefetch)
    # t_ref:   (b,)               int32,   SMEM (scalar prefetch: all task ids)
    # emb_ref: (nb_tasks, size)   float32, VMEM (whole table, resident)
    # out_ref: (tb, size)         float32, VMEM output tile
    # tbl_ref: (nb_tasks, size)   float32, VMEM scratch (gated table)
    base = pl.program_id(0) * tb

    def gate(x):
        if binarize:
            if skip_scale:
                # s is a static positive float: sign(s*x) == sign(x).
                return (x > 0.0).astype(out_ref.dtype)
            # Exact form (matches reference even if s <= 0).
            return ((s_ref[0] * x) > 0.0).astype(out_ref.dtype)
        return jax.nn.sigmoid(s_ref[0] * x).astype(out_ref.dtype)

    if table_first:
        # Gate the whole table once: nb_tasks*size EUP work instead of
        # tb*size (statically known that nb_tasks <= tb here).
        tbl_ref[...] = gate(emb_ref[...])
        src = tbl_ref
    else:
        src = emb_ref

    # Per-row gather via dynamic sublane slices; tb is small, static unroll.
    # NOTE: out-of-range task ids are not checked (torch.nn.Embedding would
    # raise); a pl.debug_check could be added under enable_debug_checks().
    for r in range(tb):
        g = base + r
        if b_padded:
            g = jnp.minimum(g, b - 1)   # tail rows replay the last real row
        tid = t_ref[g]                   # scalar SMEM read
        row = src[pl.ds(tid, 1), :]      # (1, size) dynamic row gather
        out_ref[pl.ds(r, 1), :] = row if table_first else gate(row)


def hat_mask_forward(task_embedding, t, s, binarize=False, row_tile_cap=32):
    """Pallas implementation of HATMask.forward.

    task_embedding: (nb_tasks, size) float32 embedding table
    t:              scalar or (B,) int task indices
    s:              scale (python float or 0-d array)
    returns:        (size,) for scalar t, else (B, size) float32 mask
    """
    emb = jnp.asarray(task_embedding, jnp.float32)
    nb_tasks, size = emb.shape
    t_arr = jnp.asarray(t, jnp.int32)
    scalar_t = (t_arr.ndim == 0)
    t_flat = t_arr.reshape(-1)
    b = int(t_flat.shape[0])

    # Row tiling: a single full-extent tile for small B (no padding or slicing
    # at all); otherwise balanced 8-aligned tiles so tail waste stays bounded
    # and the "parallel" grid axis has >= 2 steps for v7x dual-TC sharding.
    if b <= row_tile_cap:
        tb, b_p = b, b
    else:
        n_tiles = -(-b // row_tile_cap)
        tb = _round_up(-(-b // n_tiles), 8)
        b_p = _round_up(b, tb)

    skip_scale = bool(binarize) and isinstance(s, (int, float)) and s > 0
    table_first = nb_tasks <= tb
    s_arr = jnp.asarray(s, jnp.float32).reshape(1)

    kernel = functools.partial(
        _hat_mask_kernel,
        binarize=bool(binarize), skip_scale=skip_scale,
        table_first=table_first, tb=tb, b=b, b_padded=(b_p != b))

    grid_spec = pltpu.PrefetchScalarGridSpec(
        num_scalar_prefetch=2,                      # s and t live in SMEM
        grid=(b_p // tb,),
        in_specs=[
            # Whole table resident in VMEM (constant index_map -> no re-DMA).
            pl.BlockSpec((nb_tasks, size), lambda i, s_r, t_r: (0, 0)),
        ],
        out_specs=pl.BlockSpec((tb, size), lambda i, s_r, t_r: (i, 0)),
        scratch_shapes=[pltpu.VMEM((nb_tasks, size), jnp.float32)],
    )

    out = pl.pallas_call(
        kernel,
        grid_spec=grid_spec,
        out_shape=jax.ShapeDtypeStruct((b_p, size), jnp.float32),
        compiler_params=pltpu.CompilerParams(
            dimension_semantics=("parallel",),      # independent tiles
        ),
    )(s_arr, t_flat, emb)

    if b_p != b:
        out = out[:b]
    if scalar_t:
        out = out[0]
    return out


class HATMaskPallas:
    """JAX/Pallas counterpart of the PyTorch HATMask module.

    The embedding table is built once at construction (nothing is padded or
    re-laid-out per call), mirroring nn.Embedding.reset_parameters() + bias.
    """

    def __init__(self, nb_tasks, size, default_s, usage=0.5, key=None):
        self.default_s = default_s
        self.size = size
        self.nb_tasks = nb_tasks
        self.reset_parameters(usage, key)

    def reset_parameters(self, usage=0.5, key=None):
        key = jax.random.PRNGKey(0) if key is None else key
        bias = float(np.log(usage / (1.0 - usage)))
        # nn.Embedding.reset_parameters() ~ N(0, 1), then += bias.
        self.task_embedding = (
            jax.random.normal(key, (self.nb_tasks, self.size), jnp.float32) + bias)

    def __call__(self, t, s=None, binarize=False):
        s = self.default_s if s is None else s
        return hat_mask_forward(self.task_embedding, t, s, binarize=binarize)


if __name__ == "__main__":
    default_s = 6.0
    usage = 0.5
    key = jax.random.PRNGKey(0)

    def ref_forward(emb, t, s, binarize):
        h = jnp.asarray(emb)[jnp.asarray(t, jnp.int32)]
        m = jax.nn.sigmoid(jnp.float32(s) * h)
        return (m > 0.5).astype(jnp.float32) if binarize else m

    configs = [
        # (nb_tasks, size, task ids)
        (4, 128, 2),                                          # scalar t (common HAT call)
        (4, 128, [1, 3]),                                     # tiny batch, per-row gate path
        (6, 100, [0, 5, 2, 2, 1]),                            # non-128 feature dim
        (6, 100, [int(x) for x in (np.arange(40) * 7) % 6]),  # multi-tile, clamp, table-first
    ]

    for nb_tasks, size, t_in in configs:
        key, sub = jax.random.split(key)
        module = HATMaskPallas(nb_tasks, size, default_s, usage=usage, key=sub)
        emb = module.task_embedding
        t = jnp.asarray(t_in, jnp.int32)

        # Soft mask (default s as python float).
        mask = module(t)
        # Hard mask, static positive s -> sign-test without the multiply.
        mask_bin = module(t, binarize=True)
        # Hard mask with a traced / array s -> exact s*h > 0 path.
        mask_bin_traced = module(t, s=jnp.float32(default_s), binarize=True)
        jax.block_until_ready(mask)
        jax.block_until_ready(mask_bin)
        jax.block_until_ready(mask_bin_traced)

        mask_ref = ref_forward(emb, t, default_s, False)
        mask_bin_ref = ref_forward(emb, t, default_s, True)

        np.testing.assert_allclose(np.asarray(mask), np.asarray(mask_ref),
                                   rtol=1e-6, atol=1e-6)
        np.testing.assert_allclose(np.asarray(mask_bin), np.asarray(mask_bin_ref),
                                   rtol=0, atol=0)
        np.testing.assert_allclose(np.asarray(mask_bin_traced), np.asarray(mask_bin_ref),
                                   rtol=0, atol=0)
        assert mask.shape == mask_ref.shape, (mask.shape, mask_ref.shape)

    print("KERNEL_OK")
</pallas_src>

<mosaic_0001>
module attributes {stable_mosaic.version = 11 : i64} {
  func.func @_hat_mask_kernel(%arg0: i32, %arg1: memref<1xf32, #tpu.memory_space<smem>>, %arg2: memref<1xi32, #tpu.memory_space<smem>>, %arg3: memref<4x128xf32, #tpu.memory_space<vmem>>, %arg4: memref<1x128xf32, #tpu.memory_space<vmem>>, %arg5: memref<4x128xf32, #tpu.memory_space<vmem>>) attributes {dimension_semantics = [#tpu.dimension_semantics<parallel>], iteration_bounds = array<i64: 1>, scalar_prefetch = 2 : i64, scratch_operands = 1 : i64, tpu.core_type = #tpu.core_type<tc>, window_params = [{pipeline_mode = #tpu.pipeline_mode<synchronous>, transform_indices = @transform_0, window_bounds = array<i64: 4, 128>}, {transform_indices = @transform_1, window_bounds = array<i64: 1, 128>}]} {
    %c1_i32 = arith.constant 1 : i32
    %0 = arith.muli %arg0, %c1_i32 : i32
    %c0_i32 = arith.constant 0 : i32
    %1 = arith.addi %0, %c0_i32 : i32
    %2 = arith.index_cast %1 : i32 to index
    %3 = memref.load %arg2[%2] : memref<1xi32, #tpu.memory_space<smem>>
    %4 = arith.index_cast %3 : i32 to index
    %c0 = arith.constant 0 : index
    %5 = vector.load %arg3[%4, %c0] : memref<4x128xf32, #tpu.memory_space<vmem>>, vector<1x128xf32>
    %c0_0 = arith.constant 0 : index
    %6 = memref.load %arg1[%c0_0] : memref<1xf32, #tpu.memory_space<smem>>
    %7 = vector.broadcast %6 : f32 to vector<1x128xf32>
    %8 = arith.mulf %7, %5 : vector<1x128xf32>
    %9 = arith.negf %8 : vector<1x128xf32>
    %10 = math.exp %9 : vector<1x128xf32>
    %cst = arith.constant 1.000000e+00 : f32
    %11 = vector.broadcast %cst : f32 to vector<1x128xf32>
    %12 = arith.addf %11, %10 : vector<1x128xf32>
    %13 = arith.divf %11, %12 : vector<1x128xf32>
    %c0_1 = arith.constant 0 : index
    %c0_2 = arith.constant 0 : index
    %14 = vector.load %arg4[%c0_1, %c0_2] : memref<1x128xf32, #tpu.memory_space<vmem>>, vector<1x128xf32>
    tpu.vector_store %arg4[%c0_1, %c0_2], %13 {strides = array<i32>} : memref<1x128xf32, #tpu.memory_space<vmem>>, vector<1x128xf32>,
    return
  }
  func.func @transform_0(%arg0: i32, %arg1: memref<1xf32, #tpu.memory_space<smem>>, %arg2: memref<1xi32, #tpu.memory_space<smem>>) -> (i32, i32) {
    %c0_i32 = arith.constant 0 : i32
    %c0_i32_0 = arith.constant 0 : i32
    %c0_i32_1 = arith.constant 0 : i32
    return %c0_i32, %c0_i32_0 : i32, i32
  }
  func.func @transform_1(%arg0: i32, %arg1: memref<1xf32, #tpu.memory_space<smem>>, %arg2: memref<1xi32, #tpu.memory_space<smem>>) -> (i32, i32) {
    %c0_i32 = arith.constant 0 : i32
    %c0_i32_0 = arith.constant 0 : i32
    return %arg0, %c0_i32 : i32, i32
  }
}

</mosaic_0001>

<bundles_post_ra>
// kernel: tpu_custom_call.1
= control target key start
LH: loop header
LB: loop body
LE: loop exit
PB: predicated region body
PF: predicated region fallthrough
CT: control target
= control target key end

     0   :  { %s113_s0 = inlined_call_operand.<no memory space> [shape: f32[1], index: 0, kind: input, shape index: {}]   ;;  %s114_s1 = inlined_call_operand.<no memory space> [shape: s32[1], index: 1, kind: input, shape index: {}]   ;;  %s115_s2 = inlined_call_operand.vmem [shape: f32[4,128], index: 2, kind: input, shape index: {}]   ;;  %s116_s3 = inlined_call_operand.hbm [shape: f32[1,128], index: 3, kind: output, shape index: {}]  }
   0x1   :  { %s14_s16 = scalar_lea.vmem %s115_s2, %s114_s1  ;;  %v17_v0 = vstv %s113_s0 }
   0x2   :  { %10 = vsyncpa [#allocation7], 0  ;;  %v15_v1 = vld [vmem:[%s14_s16] sm:$0x1]  ;;  %s71_s19 = smov [#allocation6]  }
   0x3   :  { %v18_v2 = vmul.f32 %v17_v0, %v15_v1  ;;  %s32_s20 = sshll.u32 %s71_s19, 4  ;;  %s33_s20 = int_to_ptr.vmem [resolvable:$true] %s32_s20 }
   0x4   :  { %s47_s21 = scalar_lea.vmem %s33_s20, 16  ;;  %s51_s1 = scalar_lea.vmem %s33_s20, 32 }
   0x5   :  { %v41_v3 = vmul.f32 -1.442695, %v18_v2  ;;  %p48_p0 = scmp.ne.s32.totalorder %s33_s20, %s47_s21  ;;  %p52_p1 = scmp.lt.s32.totalorder %s33_s20, %s33_s20 }
   0x6   :  { %p53_p2 = scmp.lt.s32.totalorder %s51_s1, %s47_s21 }
   0x7   :  { %43 = vpow2.f32 %v41_v3 }
   0x8   :  { %p54_p3 = por %p53_p2, %p52_p1 }
   0xa   :  { %p55_p4 = pnand %p54_p3, %p48_p0 }
  0x11   :  { %v44_v4 = vpop.eup %43 }
  0x12   :  { %v22_v5 = vadd.f32 1.0, %v44_v4 }
  0x14   :  { %45 = vrcp.f32 %v22_v5 }
  0x1e   :  { %v46_v6 = vpop.eup %45 }
  0x1f   :  { %25 = vst [vmem:[#allocation6] sm:$0x1] %v46_v6 }
  0x20   :  { %58 = shalt.err (!%p55_p4)
}
  0x21   :  { %s59_s22 = scalar_lea.hbm %s116_s3, 16 }
  0x22   :  { %p60_p5 = scmp.ne.s32.totalorder %s116_s3, %s59_s22  ;;  %p63_p6 = scmp.lt.u32.totalorder %s59_s22, %s116_s3 }
  0x24   :  { %p65_p7 = pnand %p63_p6, %p60_p5 }
  0x26   :  { %68 = shalt.err (!%p65_p7)
}
  0x27   :  { %35 = dma.vmem_to_hbm [thread:$0]  %s33_s20, 16, %s116_s3, [#allocation7]  }
  0x28   :  { %69 = dma.done.wait [#allocation7], 16  }
  0x29   :  { %70 = vsyncadd [#allocation7], 4294967280 }
  0x2a   :  { %39 = vsyncpa [#allocation7], 1 }

</bundles_post_ra>
